<compile_context>
chip_gen: v7x
topology: tpu7x:2x2x1
jax: 0.10.0
libtpu: 0.0.40
codegen_flags: <defaults>
</compile_context>

<pallas_src>
import functools
import math

import jax
import jax.numpy as jnp
from jax.experimental import pallas as pl
from jax.experimental.pallas import tpu as pltpu


_FC2_CHUNK = 512  # max hidden columns processed per in-kernel chunk


def _round_up(a, b):
    return (a + b - 1) // b * b


def _pick_chunk(th_blk):
    """Largest multiple of 128 dividing th_blk that is <= _FC2_CHUNK (else th_blk)."""
    if th_blk <= _FC2_CHUNK or th_blk % 128 != 0:
        return th_blk
    c = (_FC2_CHUNK // 128) * 128
    while c >= 128:
        if th_blk % c == 0:
            return c
        c -= 128
    return th_blk


def _vmem_capacity_bytes():
    """Physical VMEM per TensorCore (generation-aware); conservative fallback."""
    try:
        info = pltpu.get_tpu_info()
        cap = getattr(info, "vmem_capacity_bytes", None)
        if cap:
            return int(cap)
    except Exception:
        pass
    return 64 << 20  # v7x per-TC VMEM; safe lower bound everywhere


def _est_vmem(tm, te, th, E, x_bytes, w_bytes, out_bytes):
    """Working-set estimate: double-buffered tiles + accumulator + fc1 temporaries."""
    chunk = _pick_chunk(th)
    return (2 * tm * E * x_bytes                        # x tiles (double-buffered)
            + 2 * E * th * w_bytes                      # W1 slices
            + 2 * th * te * w_bytes                     # W2 slices
            + 2 * 8 * _round_up(th, 128) * w_bytes      # b1 slices (layout-padded)
            + 2 * 8 * _round_up(te, 128) * w_bytes      # b2 slices
            + 2 * tm * te * out_bytes                   # output tiles
            + tm * te * 4                               # f32 accumulator scratch
            + tm * chunk * (4 + w_bytes))               # fc1 intermediate + cast copy


def _choose_tiles(M, E, H, x_bytes, w_bytes, out_bytes, tm_req, th_req, te_req, budget):
    """Pick (tm, te, th, Hp) that satisfy layout rules and fit the VMEM budget."""
    min_tm = {4: 8, 2: 16, 1: 32}.get(x_bytes, 8)

    # Row tile: full M for small problems (block == full dim is always legal),
    # otherwise a dtype-aligned multiple of min_tm (last block may be partial).
    if M <= tm_req:
        tm = M
    else:
        tm = max(min_tm, (tm_req // min_tm) * min_tm)

    # Output-column tile: only tile when E is large and 128-divisible.
    if te_req is None:
        te_req = E if E <= 4096 else 2048
    if E <= te_req or E % 128 != 0:
        te = E
    else:
        te = 128
        c = (te_req // 128) * 128
        while c >= 128:
            if E % c == 0:
                te = c
                break
            c -= 128

    # Fast path: full hidden dim resident -> weights DMA'd once for the whole call.
    if _est_vmem(tm, te, H, E, x_bytes, w_bytes, out_bytes) <= budget:
        return tm, te, H, H

    # Tiled hidden dim: th multiple of 128; H zero-padded to a multiple of th.
    th = max(128, min((th_req // 128) * 128, _round_up(H, 128)))

    while _est_vmem(tm, te, th, E, x_bytes, w_bytes, out_bytes) > budget and th > 128:
        th = max(128, (th // 2) // 128 * 128)
    while _est_vmem(tm, te, th, E, x_bytes, w_bytes, out_bytes) > budget and tm > min_tm:
        tm = max(min_tm, (tm // 2) // min_tm * min_tm)
    while (_est_vmem(tm, te, th, E, x_bytes, w_bytes, out_bytes) > budget
           and te > 128 and E % 128 == 0):
        nt = max(128, (te // 2) // 128 * 128)
        while nt > 128 and E % nt != 0:
            nt -= 128
        if E % nt != 0 or nt == te:
            break
        te = nt

    return tm, te, th, _round_up(H, th)


def _ffn_kernel(x_ref, w1_ref, b1_ref, w2_ref, b2_ref, o_ref, acc_ref,
                *, n_chunks, chunk):
    """One (tm, te, th) grid step: partial FFN with f32 accumulation over H."""
    h_idx = pl.program_id(2)

    @pl.when(h_idx == 0)
    def _init():
        acc_ref[...] = jnp.zeros_like(acc_ref)

    def fc_chunk(c0):
        # fc1 chunk + bias + ReLU (MXU matmul with f32 accumulate; VPU max).
        h = jnp.dot(x_ref[...], w1_ref[:, pl.ds(c0, chunk)],
                    preferred_element_type=jnp.float32)
        h = jnp.maximum(h + b1_ref[:, pl.ds(c0, chunk)].astype(jnp.float32), 0.0)
        # dropout -> identity (eval-mode semantics)
        # Partial fc2: this hidden chunk's contribution to the output tile.
        acc_ref[...] += jnp.dot(h.astype(w2_ref.dtype), w2_ref[pl.ds(c0, chunk), :],
                                preferred_element_type=jnp.float32)

    if n_chunks == 1:
        fc_chunk(0)
    else:
        def body(c, carry):
            fc_chunk(pl.multiple_of(c * chunk, 128))
            return carry
        jax.lax.fori_loop(0, n_chunks, body, 0, unroll=(n_chunks <= 8))

    @pl.when(h_idx == pl.num_programs(2) - 1)
    def _finalize():
        # b2 added exactly once, only in the final H step.
        o_ref[...] = (acc_ref[...] + b2_ref[...].astype(jnp.float32)).astype(o_ref.dtype)


@functools.partial(jax.jit, static_argnames=("tm", "th", "te", "compute_dtype"))
def _ffn_pallas(x2d, w1, b1, w2, b2, *, tm, th, te, compute_dtype):
    out_dtype = x2d.dtype
    if compute_dtype is not None:
        # Optional fast-MXU path: bf16 operands, f32 accumulation preserved.
        x2d = x2d.astype(compute_dtype)
        w1 = w1.astype(compute_dtype)
        w2 = w2.astype(compute_dtype)

    M, E = x2d.shape
    H = w1.shape[1]

    x_bytes = jnp.dtype(x2d.dtype).itemsize
    w_bytes = jnp.dtype(w1.dtype).itemsize
    out_bytes = jnp.dtype(out_dtype).itemsize

    physical_vmem = _vmem_capacity_bytes()
    cap = physical_vmem * 7 // 8          # generation-aware hard cap (< physical)
    budget = cap - (6 << 20)              # headroom for compiler internal scratch

    tm_eff, te_eff, th_eff, Hp = _choose_tiles(
        M, E, H, x_bytes, w_bytes, out_bytes, tm, th, te, budget)

    # Zero-pad the hidden dim (weights only) when it must be tiled.  This is exact:
    # relu(x @ 0 + 0) @ 0 == 0, so padded columns contribute nothing.
    if Hp != H:
        w1 = jnp.pad(w1, ((0, 0), (0, Hp - H)))
        b1 = jnp.pad(b1, ((0, Hp - H),))
        w2 = jnp.pad(w2, ((0, Hp - H), (0, 0)))

    b1r = b1.reshape(1, Hp)
    b2r = b2.reshape(1, E)

    gm = pl.cdiv(M, tm_eff)               # partial last row tile allowed (masked writeback)
    ge = E // te_eff
    gh = Hp // th_eff
    grid = (gm, ge, gh)

    chunk = _pick_chunk(th_eff)
    n_chunks = th_eff // chunk

    vmem_est = _est_vmem(tm_eff, te_eff, th_eff, E, x_bytes, w_bytes, out_bytes)
    vmem_limit = int(min(cap, max(vmem_est + (8 << 20), 24 << 20)))

    flops = 4 * M * E * Hp
    bytes_accessed = int(M * E * (x_bytes + out_bytes)
                         + gm * ge * E * Hp * w_bytes      # W1 streaming
                         + gm * Hp * E * w_bytes)          # W2 streaming

    kernel = functools.partial(_ffn_kernel, n_chunks=n_chunks, chunk=chunk)

    out2d = pl.pallas_call(
        kernel,
        out_shape=jax.ShapeDtypeStruct((M, E), out_dtype),
        grid_spec=pltpu.PrefetchScalarGridSpec(
            num_scalar_prefetch=0,
            grid=grid,
            in_specs=[
                pl.BlockSpec((tm_eff, E), lambda i, j, h: (i, 0)),        # x rows
                pl.BlockSpec((E, th_eff), lambda i, j, h: (0, h)),        # W1 slice
                pl.BlockSpec((1, th_eff), lambda i, j, h: (0, h)),        # b1 slice
                pl.BlockSpec((th_eff, te_eff), lambda i, j, h: (h, j)),   # W2 slice
                pl.BlockSpec((1, te_eff), lambda i, j, h: (0, j)),        # b2 slice
            ],
            out_specs=pl.BlockSpec((tm_eff, te_eff), lambda i, j, h: (i, j)),
            scratch_shapes=[pltpu.VMEM((tm_eff, te_eff), jnp.float32)],
        ),
        compiler_params=pltpu.CompilerParams(
            dimension_semantics=("parallel", "parallel", "arbitrary"),
            vmem_limit_bytes=vmem_limit,
        ),
        cost_estimate=pl.CostEstimate(
            flops=flops, transcendentals=0, bytes_accessed=bytes_accessed),
    )(x2d, w1, b1r, w2, b2r)

    return out2d


def feed_forward(x, w1, b1, w2, b2, *, tm=512, th=512, te=None, compute_dtype=None):
    """x: (B, S, E).  w1: (E, 4E), b1: (4E,), w2: (4E, E), b2: (E,)."""
    B, S, E = x.shape
    out2d = _ffn_pallas(x.reshape(B * S, E), w1, b1, w2, b2,
                        tm=tm, th=th, te=te, compute_dtype=compute_dtype)
    return out2d.reshape(B, S, E)


def init_params(key, embed_dim, dtype=jnp.float32):
    """Deterministic init mirroring nn.Linear shapes (fc1: E->4E, fc2: 4E->E)."""
    hidden = embed_dim * 4
    k1, k2, k3, k4 = jax.random.split(key, 4)
    lim1 = 1.0 / math.sqrt(embed_dim)
    lim2 = 1.0 / math.sqrt(hidden)
    # Stored pre-transposed relative to PyTorch: W1 is (E, 4E), W2 is (4E, E).
    w1 = jax.random.uniform(k1, (embed_dim, hidden), dtype, -lim1, lim1)
    b1 = jax.random.uniform(k2, (hidden,), dtype, -lim1, lim1)
    w2 = jax.random.uniform(k3, (hidden, embed_dim), dtype, -lim2, lim2)
    b2 = jax.random.uniform(k4, (embed_dim,), dtype, -lim2, lim2)
    return w1, b1, w2, b2


if __name__ == "__main__":
    key = jax.random.PRNGKey(0)
    kx, kp = jax.random.split(key)

    batch, seq, embed_dim = 2, 8, 32
    x = jax.random.normal(kx, (batch, seq, embed_dim), dtype=jnp.float32)
    w1, b1, w2, b2 = init_params(kp, embed_dim)

    out = feed_forward(x, w1, b1, w2, b2)
    out = jax.block_until_ready(out)

    # Reference check (pure JAX, eval-mode dropout == identity).
    ref = jnp.maximum(x @ w1 + b1, 0.0) @ w2 + b2
    assert out.shape == (batch, seq, embed_dim)
    assert jnp.allclose(out, ref, atol=1e-5, rtol=1e-5), "mismatch vs reference"

    print("KERNEL_OK")
</pallas_src>

<mosaic_0001>
module attributes {stable_mosaic.version = 11 : i64} {
  func.func @_ffn_kernel(%arg0: i32, %arg1: i32, %arg2: i32, %arg3: memref<16x32xf32, #tpu.memory_space<vmem>>, %arg4: memref<32x128xf32, #tpu.memory_space<vmem>>, %arg5: memref<1x128xf32, #tpu.memory_space<vmem>>, %arg6: memref<128x32xf32, #tpu.memory_space<vmem>>, %arg7: memref<1x32xf32, #tpu.memory_space<vmem>>, %arg8: memref<16x32xf32, #tpu.memory_space<vmem>>, %arg9: memref<16x32xf32, #tpu.memory_space<vmem>>) attributes {dimension_semantics = [#tpu.dimension_semantics<parallel>, #tpu.dimension_semantics<parallel>, #tpu.dimension_semantics<arbitrary>], iteration_bounds = array<i64: 1, 1, 1>, scalar_prefetch = 0 : i64, scratch_operands = 1 : i64, tpu.core_type = #tpu.core_type<tc>, window_params = [{transform_indices = @transform_0, window_bounds = array<i64: 16, 32>}, {transform_indices = @transform_1, window_bounds = array<i64: 32, 128>}, {transform_indices = @transform_2, window_bounds = array<i64: 1, 128>}, {transform_indices = @transform_3, window_bounds = array<i64: 128, 32>}, {transform_indices = @transform_4, window_bounds = array<i64: 1, 32>}, {transform_indices = @transform_5, window_bounds = array<i64: 16, 32>}]} {
    %c0_i32 = arith.constant 0 : i32
    %0 = arith.cmpi eq, %arg2, %c0_i32 : i32
    %1 = arith.extui %0 : i1 to i32
    %c0_i32_0 = arith.constant 0 : i32
    %2 = arith.cmpi ne, %1, %c0_i32_0 : i32
    scf.if %2 {
      %cst_16 = arith.constant 0.000000e+00 : f32
      %19 = vector.broadcast %cst_16 : f32 to vector<16x32xf32>
      %c0_17 = arith.constant 0 : index
      %c0_18 = arith.constant 0 : index
      %20 = vector.load %arg9[%c0_17, %c0_18] : memref<16x32xf32, #tpu.memory_space<vmem>>, vector<16x32xf32>
      tpu.vector_store %arg9[%c0_17, %c0_18], %19 {strides = array<i32>} : memref<16x32xf32, #tpu.memory_space<vmem>>, vector<16x32xf32>,
    } else {
    }
    %c0 = arith.constant 0 : index
    %c0_1 = arith.constant 0 : index
    %3 = vector.load %arg3[%c0, %c0_1] : memref<16x32xf32, #tpu.memory_space<vmem>>, vector<16x32xf32>
    %c0_2 = arith.constant 0 : index
    %c0_3 = arith.constant 0 : index
    %4 = vector.load %arg4[%c0_2, %c0_3] : memref<32x128xf32, #tpu.memory_space<vmem>>, vector<32x128xf32>
    %cst = arith.constant dense<0.000000e+00> : vector<16x128xf32>
    %5 = tpu.matmul %3, %4, %cst {dimension_numbers = #tpu.dot_dimension_numbers<[1], [0], [0], [1], [0, 0, 1, 1], [], []>} : vector<16x32xf32>, vector<32x128xf32>, vector<16x128xf32> -> vector<16x128xf32>
    %c0_4 = arith.constant 0 : index
    %c0_5 = arith.constant 0 : index
    %6 = vector.load %arg5[%c0_4, %c0_5] : memref<1x128xf32, #tpu.memory_space<vmem>>, vector<1x128xf32>
    %7 = vector.broadcast %6 : vector<1x128xf32> to vector<16x128xf32>
    %8 = arith.addf %5, %7 : vector<16x128xf32>
    %cst_6 = arith.constant 0.000000e+00 : f32
    %9 = vector.broadcast %cst_6 : f32 to vector<16x128xf32>
    %10 = arith.maximumf %8, %9 : vector<16x128xf32>
    %c0_7 = arith.constant 0 : index
    %c0_8 = arith.constant 0 : index
    %11 = vector.load %arg9[%c0_7, %c0_8] : memref<16x32xf32, #tpu.memory_space<vmem>>, vector<16x32xf32>
    %c0_9 = arith.constant 0 : index
    %c0_10 = arith.constant 0 : index
    %12 = vector.load %arg6[%c0_9, %c0_10] : memref<128x32xf32, #tpu.memory_space<vmem>>, vector<128x32xf32>
    %cst_11 = arith.constant dense<0.000000e+00> : vector<16x32xf32>
    %13 = tpu.matmul %10, %12, %cst_11 {dimension_numbers = #tpu.dot_dimension_numbers<[1], [0], [0], [1], [0, 0, 1, 1], [], []>} : vector<16x128xf32>, vector<128x32xf32>, vector<16x32xf32> -> vector<16x32xf32>
    %14 = arith.addf %11, %13 : vector<16x32xf32>
    %c0_12 = arith.constant 0 : index
    %c0_13 = arith.constant 0 : index
    %15 = vector.load %arg9[%c0_12, %c0_13] : memref<16x32xf32, #tpu.memory_space<vmem>>, vector<16x32xf32>
    tpu.vector_store %arg9[%c0_12, %c0_13], %14 {strides = array<i32>} : memref<16x32xf32, #tpu.memory_space<vmem>>, vector<16x32xf32>,
    %c0_i32_14 = arith.constant 0 : i32
    %16 = arith.cmpi eq, %arg2, %c0_i32_14 : i32
    %17 = arith.extui %16 : i1 to i32
    %c0_i32_15 = arith.constant 0 : i32
    %18 = arith.cmpi ne, %17, %c0_i32_15 : i32
    scf.if %18 {
      %c0_16 = arith.constant 0 : index
      %c0_17 = arith.constant 0 : index
      %19 = vector.load %arg9[%c0_16, %c0_17] : memref<16x32xf32, #tpu.memory_space<vmem>>, vector<16x32xf32>
      %c0_18 = arith.constant 0 : index
      %c0_19 = arith.constant 0 : index
      %20 = vector.load %arg7[%c0_18, %c0_19] : memref<1x32xf32, #tpu.memory_space<vmem>>, vector<1x32xf32>
      %21 = vector.broadcast %20 : vector<1x32xf32> to vector<16x32xf32>
      %22 = arith.addf %19, %21 : vector<16x32xf32>
      %c0_20 = arith.constant 0 : index
      %c0_21 = arith.constant 0 : index
      %23 = vector.load %arg8[%c0_20, %c0_21] : memref<16x32xf32, #tpu.memory_space<vmem>>, vector<16x32xf32>
      tpu.vector_store %arg8[%c0_20, %c0_21], %22 {strides = array<i32>} : memref<16x32xf32, #tpu.memory_space<vmem>>, vector<16x32xf32>,
    } else {
    }
    return
  }
  func.func @transform_0(%arg0: i32, %arg1: i32, %arg2: i32) -> (i32, i32) {
    %c0_i32 = arith.constant 0 : i32
    %c0_i32_0 = arith.constant 0 : i32
    return %arg0, %c0_i32 : i32, i32
  }
  func.func @transform_1(%arg0: i32, %arg1: i32, %arg2: i32) -> (i32, i32) {
    %c0_i32 = arith.constant 0 : i32
    %c0_i32_0 = arith.constant 0 : i32
    return %c0_i32, %arg2 : i32, i32
  }
  func.func @transform_2(%arg0: i32, %arg1: i32, %arg2: i32) -> (i32, i32) {
    %c0_i32 = arith.constant 0 : i32
    %c0_i32_0 = arith.constant 0 : i32
    return %c0_i32, %arg2 : i32, i32
  }
  func.func @transform_3(%arg0: i32, %arg1: i32, %arg2: i32) -> (i32, i32) {
    %c0_i32 = arith.constant 0 : i32
    return %arg2, %arg1 : i32, i32
  }
  func.func @transform_4(%arg0: i32, %arg1: i32, %arg2: i32) -> (i32, i32) {
    %c0_i32 = arith.constant 0 : i32
    %c0_i32_0 = arith.constant 0 : i32
    return %c0_i32, %arg1 : i32, i32
  }
  func.func @transform_5(%arg0: i32, %arg1: i32, %arg2: i32) -> (i32, i32) {
    %c0_i32 = arith.constant 0 : i32
    return %arg0, %arg1 : i32, i32
  }
}

</mosaic_0001>

<bundles_post_ra>
// kernel: _ffn_pallas.1
= control target key start
LH: loop header
LB: loop body
LE: loop exit
PB: predicated region body
PF: predicated region fallthrough
CT: control target
= control target key end

     0   :  { %vm25_vm0 = vcmask 261120   ;;  %s522_s0 = inlined_call_operand.vmem [shape: f32[16,32], index: 0, kind: input, shape index: {}]   ;;  %s523_s1 = inlined_call_operand.vmem [shape: f32[32,128], index: 1, kind: input, shape index: {}]   ;;  %s524_s2 = inlined_call_operand.vmem [shape: f32[1,128], index: 2, kind: input, shape index: {}]   ;;  %s525_s3 = inlined_call_operand.vmem [shape: f32[128,32], index: 3, kind: input, shape index: {}]   ;;  %s526_s4 = inlined_call_operand.vmem [shape: f32[1,32], index: 4, kind: input, shape index: {}]   ;;  %s527_s5 = inlined_call_operand.hbm [shape: f32[16,32], index: 5, kind: output, shape index: {}]  }
   0x1   :  { %v30_v0 = vld [vmem:[%s523_s1] sm:$0xff]  ;;  %v31_v1 = vld [vmem:[%s523_s1 + $0x8] sm:$0xff]  ;;  %v32_v2 = vld [vmem:[%s523_s1 + $0x10] sm:$0xff] }
   0x2   :  { %v328_v3 = vpack.c.bf16 %v31_v1, %v30_v0  ;;  %v33_v4 = vld [vmem:[%s523_s1 + $0x18] sm:$0xff]  ;;  %v28_v5 = vld [vmem:[%s522_s0] sm:$0xff]  ;;  %v128_v8 = vld [vmem:[%s525_s3 + $0x8] sm:$0xff] }
   0x3   :  { %v332_v6 = vpack.c.bf16 %v33_v4, %v32_v2  ;;  %290 = vmatprep.mubr.msk.f32.mxu0 %vm25_vm0, %v28_v5  ;;  %v127_v7 = vld [vmem:[%s525_s3] sm:$0xff]  ;;  %v129_v9 = vld [vmem:[%s525_s3 + $0x10] sm:$0xff]  ;;  %v130_v11 = vld [vmem:[%s525_s3 + $0x18] sm:$0xff] }
   0x4   :  { %329 = vmatprep.subr.bf16.mxu0 %v328_v3  ;;  %v336_v10 = vpack.c.bf16 %v128_v8, %v127_v7  ;;  %v340_v12 = vpack.c.bf16 %v130_v11, %v129_v9  ;;  %v131_v13 = vld [vmem:[%s525_s3 + $0x20] sm:$0xff]  ;;  %v132_v14 = vld [vmem:[%s525_s3 + $0x28] sm:$0xff] }
   0x5   :  { %331 = vmatpush3.bf16.msra.mxu0 %v328_v3 }
   0x6   :  { %333 = vmatprep.subr.bf16.mxu0 %v332_v6  ;;  %337 = vmatprep.subr.bf16.mxu1 %v336_v10 }
   0x7   :  { %339 = vmatpush3.bf16.msra.mxu1 %v336_v10 }
   0x8   :  { %10 = vsyncpa [#allocation4], 0  ;;  %341 = vmatprep.subr.bf16.mxu1 %v340_v12  ;;  %v344_v15 = vpack.c.bf16 %v132_v14, %v131_v13  ;;  %v29_v16 = vld [vmem:[%s522_s0 + $0x8] sm:$0xff]  ;;  %v133_v17 = vld [vmem:[%s525_s3 + $0x30] sm:$0xff]  ;;  %v396_v32 = vmov 0.0   ;;  %s397_s11 = smov [#allocation3]  }
   0x9   :  { %335 = vmatpush3.bf16.msra.mxu0 %v332_v6  ;;  %v134_v18 = vld [vmem:[%s525_s3 + $0x38] sm:$0xff]  ;;  %v135_v20 = vld [vmem:[%s525_s3 + $0x40] sm:$0xff]  ;;  %v136_v21 = vld [vmem:[%s525_s3 + $0x48] sm:$0xff]  ;;  %27 = vst.msk [vmem:[#allocation2 + $0x8] sm:$0xff] %vm25_vm0, %v396_v32  ;;  %s243_s12 = sshll.u32 %s397_s11, 4  ;;  %s244_s12 = int_to_ptr.vmem [resolvable:$true] %s243_s12 }
   0xa   :  { %v348_v19 = vpack.c.bf16 %v134_v18, %v133_v17  ;;  %v352_v22 = vpack.c.bf16 %v136_v21, %v135_v20  ;;  %v137_v23 = vld [vmem:[%s525_s3 + $0x50] sm:$0xff]  ;;  %v138_v24 = vld [vmem:[%s525_s3 + $0x58] sm:$0xff]  ;;  %v139_v26 = vld [vmem:[%s525_s3 + $0x60] sm:$0xff]  ;;  %26 = vst.msk [vmem:[#allocation2] sm:$0xff] %vm25_vm0, %v396_v32  ;;  %s372_s13 = scalar_lea.vmem %s244_s12, 256  ;;  %p377_p1 = scmp.lt.s32.totalorder %s244_s12, %s244_s12 }
   0xb   :  { %343 = vmatpush3.bf16.msra.mxu1 %v340_v12  ;;  %v356_v25 = vpack.c.bf16 %v138_v24, %v137_v23  ;;  %v140_v27 = vld [vmem:[%s525_s3 + $0x68] sm:$0xff]  ;;  %v141_v29 = vld [vmem:[%s525_s3 + $0x70] sm:$0xff]  ;;  %v142_v30 = vld [vmem:[%s525_s3 + $0x78] sm:$0xff]  ;;  %p373_p0 = scmp.ne.s32.totalorder %s244_s12, %s372_s13  ;;  %p378_p2 = scmp.lt.s32.totalorder %s372_s13, %s372_s13 }
   0xc   :  { %291 = vmatmul.mubr.msk.f32.vlgmr.msra.gmra.mrb[0].mxu0 %vm25_vm0, %v29_v16  ;;  %345 = vmatprep.subr.bf16.mxu1 %v344_v15  ;;  %v360_v28 = vpack.c.bf16 %v140_v27, %v139_v26  ;;  %v364_v31 = vpack.c.bf16 %v142_v30, %v141_v29  ;;  %v254_v33 = vld [vmem:[%s524_s2] ss:$0 sm:$0xff] }
   0xd   :  { %v257_v46 = vld [vmem:[%s526_s4] ss:$0 sm:$0xff]  ;;  %p379_p3 = por %p378_p2, %p377_p1 }
   0xf   :  { %347 = vmatpush3.bf16.msra.mxu1 %v344_v15  ;;  %p380_p4 = pnand %p379_p3, %p373_p0 }
  0x10   :  { %349 = vmatprep.subr.bf16.mxu1 %v348_v19  ;;  %v126_v40 = vld [vmem:[#allocation2 + $0x8] sm:$0xff] }
  0x11   :  { %v125_v41 = vld [vmem:[#allocation2] sm:$0xff] }
  0x13   :  { %351 = vmatpush3.bf16.msra.mxu1 %v348_v19 }
  0x14   :  { %353 = vmatprep.subr.bf16.mxu1 %v352_v22 }
  0x17   :  { %355 = vmatpush3.bf16.msra.mxu1 %v352_v22 }
  0x18   :  { %357 = vmatprep.subr.bf16.mxu1 %v356_v25 }
  0x1b   :  { %359 = vmatpush3.bf16.msra.mxu1 %v356_v25 }
  0x1c   :  { %361 = vmatprep.subr.bf16.mxu1 %v360_v28 }
  0x1f   :  { %363 = vmatpush3.bf16.msra.mxu1 %v360_v28 }
  0x20   :  { %365 = vmatprep.subr.bf16.mxu1 %v364_v31 }
  0x23   :  { %367 = vmatpush3.bf16.msra.mxu1 %v364_v31 }
  0xdf   :  { %v292_v34 = vpop.f32.mrb[0].mxu0 }
  0xe0   :  { %v120_v35 = vadd.f32 %v292_v34, %v254_v33  ;;  %v114_v36 = vpop.f32.mrb[1].mxu0 }
  0xe1   :  { %v115_v37 = vadd.f32 %v254_v33, %v114_v36 }
  0xe2   :  { %v124_v39 = vmax.f32 %v120_v35, 0.0 }
  0xe3   :  { %v123_v38 = vmax.f32 %v115_v37, 0.0 }
  0xe5   :  { %325 = vmatprep.mubr.f32.mxu1 %v123_v38 }
  0xe6   :  { %326 = vmatmul.mubr.f32.vlgmr.msra.gmra.mrb[0].mxu1 %v124_v39 }
 0x1b9   :  { %v327_v42 = vpop.f32.mrb[0].mxu1 }
 0x1ba   :  { %v219_v43 = vadd.f32 %v327_v42, %v126_v40  ;;  %v209_v44 = vpop.f32.mrb[1].mxu1 }
 0x1bb   :  { %v218_v45 = vadd.f32 %v209_v44, %v125_v41 }
 0x1bc   :  { %221 = vst.msk [vmem:[#allocation2 + $0x8] sm:$0xff] %vm25_vm0, %v219_v43 }
 0x1bd   :  { %220 = vst.msk [vmem:[#allocation2] sm:$0xff] %vm25_vm0, %v218_v45 }
 0x1c3   :  { %v226_v47 = vld [vmem:[#allocation2 + $0x8] sm:$0xff] }
 0x1c4   :  { %v225_v48 = vld [vmem:[#allocation2] sm:$0xff]  ;;  %v235_v49 = vadd.f32 %v257_v46, %v226_v47 }
 0x1c5   :  { %v234_v50 = vadd.f32 %v257_v46, %v225_v48 }
 0x1c6   :  { %237 = vst.msk [vmem:[#allocation3 + $0x8] sm:$0xff] %vm25_vm0, %v235_v49 }
 0x1c7   :  { %236 = vst.msk [vmem:[#allocation3] sm:$0xff] %vm25_vm0, %v234_v50 }
 0x1c8   :  { %383 = shalt.err (!%p380_p4)
}
 0x1c9   :  { %s384_s15 = scalar_lea.hbm %s527_s5, 256 }
 0x1ca   :  { %p385_p5 = scmp.ne.s32.totalorder %s527_s5, %s384_s15  ;;  %p388_p6 = scmp.lt.u32.totalorder %s384_s15, %s527_s5 }
 0x1cc   :  { %p390_p7 = pnand %p388_p6, %p385_p5 }
 0x1ce   :  { %393 = shalt.err (!%p390_p7)
}
 0x1cf   :  { %s398_s20 = smov 128   ;;  %s399_s21 = smov 8  }
 0x1d0   :  { %249 = dma.vmem_to_hbm [thread:$0]  %s244_s12, 256, %s527_s5, [#allocation4], %s398_s20, %s398_s20, %s399_s21  }
 0x1d1   :  { %394 = dma.done.wait [#allocation4], 256  }
 0x1d2   :  { %395 = vsyncadd [#allocation4], 4294967040 }
 0x1d3   :  { %253 = vsyncpa [#allocation4], 1 }

</bundles_post_ra>
